<compile_context>
chip_gen: v7x
topology: tpu7x:2x2x1
jax: 0.10.0
libtpu: 0.0.40
codegen_flags: <defaults>
</compile_context>

<pallas_src>
import jax
import jax.numpy as jnp
from jax.experimental import pallas as pl
from jax.experimental.pallas import tpu as pltpu

LANE = 128   # TPU lane width
H1 = 16      # encoder hidden 1 (PyTorch)
H2 = 32      # encoder hidden 2 (PyTorch)
H1P = LANE   # lane-padded hidden widths
H2P = LANE


def _round_up(x: int, m: int) -> int:
    return (x + m - 1) // m * m


def _cdiv(a: int, b: int) -> int:
    return (a + b - 1) // b


def _pad2(a, rows: int, cols: int):
    return jnp.pad(a, ((0, rows - a.shape[0]), (0, cols - a.shape[1])))


# --------------------------------------------------------------------------- #
# Kernel: encoder (2x Linear+ReLU) + fused head matmul, one lane-dense output. #
# --------------------------------------------------------------------------- #
def hybrid_policy_kernel(x_ref, w1_ref, b1_ref, w2_ref, b2_ref,
                         wh_ref, bh_ref, out_ref):
    # x is streamed in as f32; cast to the weight dtype in VMEM (no-op on f32 path).
    x = x_ref[...].astype(w1_ref.dtype)

    # Encoder layer 1: Linear(obs, 16->128 padded) + ReLU   (f32 accumulate)
    h1 = jnp.dot(x, w1_ref[...], preferred_element_type=jnp.float32) + b1_ref[...]
    h1 = jnp.maximum(h1, 0.0)

    # Encoder layer 2: Linear(16, 32->128 padded) + ReLU
    h2 = jnp.dot(h1.astype(w2_ref.dtype), w2_ref[...],
                 preferred_element_type=jnp.float32) + b2_ref[...]
    h2 = jnp.maximum(h2, 0.0)

    # Fused heads: [action_type_head | action_args_mu] in one matmul, stored as
    # a single lane-dense slab (bf16 by default) and sliced apart in the wrapper.
    head = jnp.dot(h2.astype(wh_ref.dtype), wh_ref[...],
                   preferred_element_type=jnp.float32) + bh_ref[...]
    out_ref[...] = head.astype(out_ref.dtype)


# --------------------------------------------------------------------------- #
# Parameter prep: fuse heads, zero-pad to lane-dense shapes, pre-compute sigma #
# --------------------------------------------------------------------------- #
def prepare_kernel_params(params, compute_dtype=jnp.float32):
    """params holds PyTorch-equivalent (in, out)-transposed weights (unpadded)."""
    obs = params["w1"].shape[0]
    a_type = params["wt"].shape[1]
    a_args = params["wm"].shape[1]
    out_p = _round_up(a_type + a_args, LANE)

    head_w = jnp.concatenate([params["wt"], params["wm"]], axis=1)   # (32, at+aa)
    head_b = jnp.concatenate([params["bt"], params["bm"]], axis=1)   # (1,  at+aa)

    return {
        # MXU weight inputs may be bf16 (VMEM-resident, negligible traffic);
        # biases / accumulation / elementwise stay f32 (v5e has no bf16 VPU).
        "w1": _pad2(params["w1"], obs, H1P).astype(compute_dtype),
        "b1": _pad2(params["b1"], 1, H1P).astype(jnp.float32),
        "w2": _pad2(params["w2"], H1P, H2P).astype(compute_dtype),
        "b2": _pad2(params["b2"], 1, H2P).astype(jnp.float32),
        "wh": _pad2(head_w, H2P, out_p).astype(compute_dtype),
        "bh": _pad2(head_b, 1, out_p).astype(jnp.float32),
        # sigma is batch-independent: compute exp(log_sigma) once, outside kernel.
        "sigma": jnp.exp(params["log_sigma"]).astype(jnp.float32),
        # static metadata
        "obs": obs, "a_type": a_type, "a_args": a_args, "out_p": out_p,
    }


# --------------------------------------------------------------------------- #
# Wrapper: ragged batch-tiled pallas_call + output un-packing                  #
# --------------------------------------------------------------------------- #
def hybrid_policy_forward(x, kp, *, batch_tile=1024, out_dtype=jnp.bfloat16):
    B, obs = x.shape
    assert obs == kp["obs"]
    a_type, a_args, out_p = kp["a_type"], kp["a_args"], kp["out_p"]

    # Batch tile: multiple of 8 sublanes, sized so the grid has >=2 steps
    # whenever B allows (both v7x TensorCores get work, DMA pipeline has depth),
    # capped at batch_tile.  No wrapper-side padding: the grid is ragged and
    # Pallas clips the partial last block's writeback; the garbage tail rows of
    # that block never reach HBM beyond row B.
    tb = max(8, min(batch_tile, _round_up(_cdiv(B, 2), 8)))
    grid = (_cdiv(B, tb),)

    def resident(shape):
        # Invariant operands: index_map -> (0,0) every step, so they stay
        # VMEM-resident.  (pipeline_mode=pl.Buffered(1) would drop the default
        # double-buffering, but VMEM is nowhere near binding at these sizes.)
        return pl.BlockSpec(shape, lambda i: (0, 0))

    out = pl.pallas_call(
        hybrid_policy_kernel,
        out_shape=jax.ShapeDtypeStruct((B, out_p), out_dtype),
        grid=grid,
        in_specs=[
            pl.BlockSpec((tb, obs), lambda i: (i, 0)),     # x: tiled over batch (f32)
            resident((obs, H1P)), resident((1, H1P)),      # w1, b1
            resident((H1P, H2P)), resident((1, H2P)),      # w2, b2
            resident((H2P, out_p)), resident((1, out_p)),  # fused head w, b
        ],
        out_specs=pl.BlockSpec((tb, out_p), lambda i: (i, 0)),
        compiler_params=pltpu.CompilerParams(
            dimension_semantics=("parallel",),   # shard batch over v7x's 2 TCs
        ),
    )(x, kp["w1"], kp["b1"], kp["w2"], kp["b2"], kp["wh"], kp["bh"])

    logit = out[:, :a_type].astype(jnp.float32)
    mu = out[:, a_type:a_type + a_args].astype(jnp.float32)
    sigma = jnp.broadcast_to(kp["sigma"], (B, a_args))
    return {"action_type": logit, "action_args": {"mu": mu, "sigma": sigma}}


# --------------------------------------------------------------------------- #
# Synthetic init (PyTorch-equivalent layout: (in, out) weights, (1, out) bias) #
# --------------------------------------------------------------------------- #
def init_params(key, obs_shape, action_type_shape, action_args_shape):
    ks = jax.random.split(key, 8)

    def w(k, fan_in, fan_out):
        return jax.random.normal(k, (fan_in, fan_out), jnp.float32) * 0.1

    def b(k, fan_out):
        return jax.random.normal(k, (1, fan_out), jnp.float32) * 0.01

    return {
        "w1": w(ks[0], obs_shape, H1), "b1": b(ks[1], H1),
        "w2": w(ks[2], H1, H2),        "b2": b(ks[3], H2),
        "wt": w(ks[4], H2, action_type_shape), "bt": b(ks[5], action_type_shape),
        "wm": w(ks[6], H2, action_args_shape), "bm": b(ks[7], action_args_shape),
        # nn.Parameter(torch.zeros(1, action_args_shape))
        "log_sigma": jnp.zeros((1, action_args_shape), jnp.float32),
    }


def reference_forward(x, params):
    """Pure-JAX reference matching the PyTorch forward exactly."""
    h = jnp.maximum(x @ params["w1"] + params["b1"], 0.0)
    h = jnp.maximum(h @ params["w2"] + params["b2"], 0.0)
    logit = h @ params["wt"] + params["bt"]
    mu = h @ params["wm"] + params["bm"]
    sigma = jnp.exp(params["log_sigma"] + jnp.zeros_like(mu))
    return {"action_type": logit, "action_args": {"mu": mu, "sigma": sigma}}


if __name__ == "__main__":
    B = 2
    OBS = 16
    ACTION_TYPE = 4
    ACTION_ARGS = 6

    key = jax.random.PRNGKey(0)
    kx, kp_key = jax.random.split(key)
    x = jax.random.normal(kx, (B, OBS), jnp.float32)
    params = init_params(kp_key, OBS, ACTION_TYPE, ACTION_ARGS)
    ref = reference_forward(x, params)

    kparams_f32 = prepare_kernel_params(params, compute_dtype=jnp.float32)

    # ---- f32 weights + f32 output: exact PyTorch semantics ----
    out = hybrid_policy_forward(x, kparams_f32, out_dtype=jnp.float32)
    out = jax.tree_util.tree_map(jax.block_until_ready, out)
    assert out["action_type"].shape == (B, ACTION_TYPE)
    assert out["action_args"]["mu"].shape == (B, ACTION_ARGS)
    assert out["action_args"]["sigma"].shape == (B, ACTION_ARGS)
    assert jnp.allclose(out["action_type"], ref["action_type"], atol=1e-4)
    assert jnp.allclose(out["action_args"]["mu"], ref["action_args"]["mu"], atol=1e-4)
    assert jnp.allclose(out["action_args"]["sigma"], ref["action_args"]["sigma"], atol=1e-4)

    # ---- default path: f32 weights, bf16 output writeback (HBM-traffic win) ----
    out_bf = hybrid_policy_forward(x, kparams_f32)
    out_bf = jax.tree_util.tree_map(jax.block_until_ready, out_bf)
    assert jnp.allclose(out_bf["action_type"], ref["action_type"], atol=5e-2, rtol=5e-2)
    assert jnp.allclose(out_bf["action_args"]["mu"], ref["action_args"]["mu"],
                        atol=5e-2, rtol=5e-2)
    assert jnp.allclose(out_bf["action_args"]["sigma"], ref["action_args"]["sigma"],
                        atol=1e-6)

    # ---- bf16 MXU-weight path (perf option; f32 accumulation) ----
    kparams_bf16 = prepare_kernel_params(params, compute_dtype=jnp.bfloat16)
    out_b16 = hybrid_policy_forward(x, kparams_bf16)
    out_b16 = jax.tree_util.tree_map(jax.block_until_ready, out_b16)
    assert jnp.allclose(out_b16["action_type"], ref["action_type"], atol=0.1, rtol=0.1)
    assert jnp.allclose(out_b16["action_args"]["mu"], ref["action_args"]["mu"],
                        atol=0.1, rtol=0.1)

    # ---- ragged multi-step grid (B not tile-aligned): exercises Pallas clipping ----
    B2 = 50
    x2 = jax.random.normal(jax.random.PRNGKey(1), (B2, OBS), jnp.float32)
    ref2 = reference_forward(x2, params)
    out2 = hybrid_policy_forward(x2, kparams_f32, out_dtype=jnp.float32)
    out2 = jax.tree_util.tree_map(jax.block_until_ready, out2)
    assert out2["action_type"].shape == (B2, ACTION_TYPE)
    assert jnp.allclose(out2["action_type"], ref2["action_type"], atol=1e-4)
    assert jnp.allclose(out2["action_args"]["mu"], ref2["action_args"]["mu"], atol=1e-4)

    print("KERNEL_OK")
</pallas_src>

<mosaic_0001>
module attributes {stable_mosaic.version = 11 : i64} {
  func.func @hybrid_policy_kernel(%arg0: i32, %arg1: memref<8x16xf32, #tpu.memory_space<vmem>>, %arg2: memref<16x128xf32, #tpu.memory_space<vmem>>, %arg3: memref<1x128xf32, #tpu.memory_space<vmem>>, %arg4: memref<128x128xf32, #tpu.memory_space<vmem>>, %arg5: memref<1x128xf32, #tpu.memory_space<vmem>>, %arg6: memref<128x128xf32, #tpu.memory_space<vmem>>, %arg7: memref<1x128xf32, #tpu.memory_space<vmem>>, %arg8: memref<8x128xf32, #tpu.memory_space<vmem>>) attributes {dimension_semantics = [#tpu.dimension_semantics<parallel>], iteration_bounds = array<i64: 1>, scalar_prefetch = 0 : i64, scratch_operands = 0 : i64, tpu.core_type = #tpu.core_type<tc>, window_params = [{transform_indices = @transform_0, window_bounds = array<i64: 8, 16>}, {pipeline_mode = #tpu.pipeline_mode<synchronous>, transform_indices = @transform_1, window_bounds = array<i64: 16, 128>}, {pipeline_mode = #tpu.pipeline_mode<synchronous>, transform_indices = @transform_2, window_bounds = array<i64: 1, 128>}, {pipeline_mode = #tpu.pipeline_mode<synchronous>, transform_indices = @transform_3, window_bounds = array<i64: 128, 128>}, {pipeline_mode = #tpu.pipeline_mode<synchronous>, transform_indices = @transform_4, window_bounds = array<i64: 1, 128>}, {pipeline_mode = #tpu.pipeline_mode<synchronous>, transform_indices = @transform_5, window_bounds = array<i64: 128, 128>}, {pipeline_mode = #tpu.pipeline_mode<synchronous>, transform_indices = @transform_6, window_bounds = array<i64: 1, 128>}, {transform_indices = @transform_7, window_bounds = array<i64: 8, 128>}]} {
    %c0 = arith.constant 0 : index
    %c0_0 = arith.constant 0 : index
    %0 = vector.load %arg1[%c0, %c0_0] : memref<8x16xf32, #tpu.memory_space<vmem>>, vector<8x16xf32>
    %c0_1 = arith.constant 0 : index
    %c0_2 = arith.constant 0 : index
    %1 = vector.load %arg2[%c0_1, %c0_2] : memref<16x128xf32, #tpu.memory_space<vmem>>, vector<16x128xf32>
    %cst = arith.constant dense<0.000000e+00> : vector<8x128xf32>
    %2 = tpu.matmul %0, %1, %cst {dimension_numbers = #tpu.dot_dimension_numbers<[1], [0], [0], [1], [0, 0, 1, 1], [], []>} : vector<8x16xf32>, vector<16x128xf32>, vector<8x128xf32> -> vector<8x128xf32>
    %c0_3 = arith.constant 0 : index
    %c0_4 = arith.constant 0 : index
    %3 = vector.load %arg3[%c0_3, %c0_4] : memref<1x128xf32, #tpu.memory_space<vmem>>, vector<1x128xf32>
    %4 = vector.broadcast %3 : vector<1x128xf32> to vector<8x128xf32>
    %5 = arith.addf %2, %4 : vector<8x128xf32>
    %cst_5 = arith.constant 0.000000e+00 : f32
    %6 = vector.broadcast %cst_5 : f32 to vector<8x128xf32>
    %7 = arith.maximumf %5, %6 : vector<8x128xf32>
    %c0_6 = arith.constant 0 : index
    %c0_7 = arith.constant 0 : index
    %8 = vector.load %arg4[%c0_6, %c0_7] : memref<128x128xf32, #tpu.memory_space<vmem>>, vector<128x128xf32>
    %cst_8 = arith.constant dense<0.000000e+00> : vector<8x128xf32>
    %9 = tpu.matmul %7, %8, %cst_8 {dimension_numbers = #tpu.dot_dimension_numbers<[1], [0], [0], [1], [0, 0, 1, 1], [], []>} : vector<8x128xf32>, vector<128x128xf32>, vector<8x128xf32> -> vector<8x128xf32>
    %c0_9 = arith.constant 0 : index
    %c0_10 = arith.constant 0 : index
    %10 = vector.load %arg5[%c0_9, %c0_10] : memref<1x128xf32, #tpu.memory_space<vmem>>, vector<1x128xf32>
    %11 = vector.broadcast %10 : vector<1x128xf32> to vector<8x128xf32>
    %12 = arith.addf %9, %11 : vector<8x128xf32>
    %cst_11 = arith.constant 0.000000e+00 : f32
    %13 = vector.broadcast %cst_11 : f32 to vector<8x128xf32>
    %14 = arith.maximumf %12, %13 : vector<8x128xf32>
    %c0_12 = arith.constant 0 : index
    %c0_13 = arith.constant 0 : index
    %15 = vector.load %arg6[%c0_12, %c0_13] : memref<128x128xf32, #tpu.memory_space<vmem>>, vector<128x128xf32>
    %cst_14 = arith.constant dense<0.000000e+00> : vector<8x128xf32>
    %16 = tpu.matmul %14, %15, %cst_14 {dimension_numbers = #tpu.dot_dimension_numbers<[1], [0], [0], [1], [0, 0, 1, 1], [], []>} : vector<8x128xf32>, vector<128x128xf32>, vector<8x128xf32> -> vector<8x128xf32>
    %c0_15 = arith.constant 0 : index
    %c0_16 = arith.constant 0 : index
    %17 = vector.load %arg7[%c0_15, %c0_16] : memref<1x128xf32, #tpu.memory_space<vmem>>, vector<1x128xf32>
    %18 = vector.broadcast %17 : vector<1x128xf32> to vector<8x128xf32>
    %19 = arith.addf %16, %18 : vector<8x128xf32>
    %c0_17 = arith.constant 0 : index
    %c0_18 = arith.constant 0 : index
    %20 = vector.load %arg8[%c0_17, %c0_18] : memref<8x128xf32, #tpu.memory_space<vmem>>, vector<8x128xf32>
    tpu.vector_store %arg8[%c0_17, %c0_18], %19 {strides = array<i32>} : memref<8x128xf32, #tpu.memory_space<vmem>>, vector<8x128xf32>,
    return
  }
  func.func @transform_0(%arg0: i32) -> (i32, i32) {
    %c0_i32 = arith.constant 0 : i32
    %c0_i32_0 = arith.constant 0 : i32
    return %arg0, %c0_i32 : i32, i32
  }
  func.func @transform_1(%arg0: i32) -> (i32, i32) {
    %c0_i32 = arith.constant 0 : i32
    %c0_i32_0 = arith.constant 0 : i32
    %c0_i32_1 = arith.constant 0 : i32
    return %c0_i32, %c0_i32_0 : i32, i32
  }
  func.func @transform_2(%arg0: i32) -> (i32, i32) {
    %c0_i32 = arith.constant 0 : i32
    %c0_i32_0 = arith.constant 0 : i32
    %c0_i32_1 = arith.constant 0 : i32
    return %c0_i32, %c0_i32_0 : i32, i32
  }
  func.func @transform_3(%arg0: i32) -> (i32, i32) {
    %c0_i32 = arith.constant 0 : i32
    %c0_i32_0 = arith.constant 0 : i32
    %c0_i32_1 = arith.constant 0 : i32
    return %c0_i32, %c0_i32_0 : i32, i32
  }
  func.func @transform_4(%arg0: i32) -> (i32, i32) {
    %c0_i32 = arith.constant 0 : i32
    %c0_i32_0 = arith.constant 0 : i32
    %c0_i32_1 = arith.constant 0 : i32
    return %c0_i32, %c0_i32_0 : i32, i32
  }
  func.func @transform_5(%arg0: i32) -> (i32, i32) {
    %c0_i32 = arith.constant 0 : i32
    %c0_i32_0 = arith.constant 0 : i32
    %c0_i32_1 = arith.constant 0 : i32
    return %c0_i32, %c0_i32_0 : i32, i32
  }
  func.func @transform_6(%arg0: i32) -> (i32, i32) {
    %c0_i32 = arith.constant 0 : i32
    %c0_i32_0 = arith.constant 0 : i32
    %c0_i32_1 = arith.constant 0 : i32
    return %c0_i32, %c0_i32_0 : i32, i32
  }
  func.func @transform_7(%arg0: i32) -> (i32, i32) {
    %c0_i32 = arith.constant 0 : i32
    %c0_i32_0 = arith.constant 0 : i32
    return %arg0, %c0_i32 : i32, i32
  }
}

</mosaic_0001>

<bundles_post_ra>
// kernel: tpu_custom_call.1
= control target key start
LH: loop header
LB: loop body
LE: loop exit
PB: predicated region body
PF: predicated region fallthrough
CT: control target
= control target key end

     0   :  { %12 = vsyncpa [#allocation3], 0  ;;  %s836_s0 = inlined_call_operand.hbm [shape: f32[2,16], index: 0, kind: input, shape index: {}]   ;;  %s837_s1 = inlined_call_operand.hbm [shape: f32[16,128], index: 1, kind: input, shape index: {}]   ;;  %s838_s2 = inlined_call_operand.vmem [shape: f32[1,128], index: 2, kind: input, shape index: {}]   ;;  %s839_s3 = inlined_call_operand.hbm [shape: f32[128,128], index: 3, kind: input, shape index: {}]   ;;  %s840_s4 = inlined_call_operand.vmem [shape: f32[1,128], index: 4, kind: input, shape index: {}]   ;;  %s841_s5 = inlined_call_operand.hbm [shape: f32[128,128], index: 5, kind: input, shape index: {}]   ;;  %s842_s6 = inlined_call_operand.vmem [shape: f32[1,128], index: 6, kind: input, shape index: {}]   ;;  %s843_s7 = inlined_call_operand.hbm [shape: f32[2,128], index: 7, kind: output, shape index: {}]  }
   0x1   :  { %13 = vsyncpa [#allocation6], 0 }
   0x2   :  { %14 = vsyncpa [#allocation9], 0 }
   0x3   :  { %15 = vsyncpa [#allocation4], 0 }
   0x4   :  { %20 = vsyncadd [#allocation3], 96  ;;  %s673_s24 = smov [#allocation5]   ;;  %s555_s28 = scalar_lea.hbm %s837_s1, 256 }
   0x5   :  { %s33_s25 = sshll.u32 %s673_s24, 4  ;;  %p556_p0 = scmp.ne.s32.totalorder %s837_s1, %s555_s28  ;;  %s34_s25 = int_to_ptr.vmem [resolvable:$true] %s33_s25 }
   0x6   :  { %p559_p1 = scmp.lt.u32.totalorder %s555_s28, %s837_s1 }
   0x8   :  { %p561_p2 = pnand %p559_p1, %p556_p0 }
   0xa   :  { %564 = shalt.err (!%p561_p2)
}
   0xb   :  { %s565_s10 = scalar_lea.vmem %s34_s25, 256  ;;  %p570_p4 = scmp.lt.s32.totalorder %s34_s25, %s34_s25 }
   0xc   :  { %p566_p3 = scmp.ne.s32.totalorder %s34_s25, %s565_s10  ;;  %p571_p5 = scmp.lt.s32.totalorder %s565_s10, %s565_s10 }
   0xe   :  { %p572_p6 = por %p571_p5, %p570_p4 }
  0x10   :  { %p573_p7 = pnand %p572_p6, %p566_p3 }
  0x12   :  { %576 = shalt.err (!%p573_p7)
}
  0x13   :  { %s674_s11 = smov 128   ;;  %s675_s12 = smov 8  }
  0x14   :  { %39 = dma.hbm_to_vmem [thread:$0]  %s837_s1, 256, %s34_s25, [#allocation6], %s674_s11, %s674_s11, %s675_s12  }
  0x15   :  { %s676_s15 = smov [#allocation2]   ;;  %s577_s19 = scalar_lea.hbm %s836_s0, 32 }
  0x16   :  { %s21_s16 = sshll.u32 %s676_s15, 4  ;;  %p578_p8 = scmp.ne.s32.totalorder %s836_s0, %s577_s19  ;;  %s22_s16 = int_to_ptr.vmem [resolvable:$true] %s21_s16 }
  0x17   :  { %p581_p9 = scmp.lt.u32.totalorder %s577_s19, %s836_s0 }
  0x19   :  { %p583_p10 = pnand %p581_p9, %p578_p8 }
  0x1b   :  { %586 = shalt.err (!%p583_p10)
}
  0x1c   :  { %s587_s24 = scalar_lea.vmem %s22_s16, 32  ;;  %s591_s1 = scalar_lea.vmem %s22_s16, 128 }
  0x1d   :  { %p588_p11 = scmp.ne.s32.totalorder %s22_s16, %s587_s24  ;;  %p592_p12 = scmp.lt.s32.totalorder %s22_s16, %s22_s16 }
  0x1e   :  { %p593_p13 = scmp.lt.s32.totalorder %s591_s1, %s587_s24 }
  0x20   :  { %p594_p0 = por %p593_p13, %p592_p12 }
  0x22   :  { %p595_p1 = pnand %p594_p0, %p588_p11 }
  0x24   :  { %598 = shalt.err (!%p595_p1)
}
  0x25   :  { %s677_s25 = smov 32   ;;  %s678_s26 = smov 2  }
  0x26   :  { %27 = dma.hbm_to_vmem [thread:$0]  %s836_s0, 32, %s22_s16, [#allocation3], %s677_s25, %s677_s25, %s678_s26  }
  0x27   :  { %s679_s29 = smov [#allocation7]   ;;  %s680_s8 = smov [#allocation8]  }
  0x28   :  { %s47_s30 = sshll.u32 %s679_s29, 4  ;;  %s61_s9 = sshll.u32 %s680_s8, 4  ;;  %s48_s30 = int_to_ptr.vmem [resolvable:$true] %s47_s30  ;;  %s755_s9 = int_to_ptr.vmem [resolvable:$true] %s61_s9 }
  0x29   :  { %s599_s14 = scalar_lea.hbm %s839_s3, 2048 }
  0x2a   :  { %p600_p2 = scmp.ne.s32.totalorder %s839_s3, %s599_s14  ;;  %p603_p3 = scmp.lt.u32.totalorder %s599_s14, %s839_s3 }
  0x2c   :  { %p605_p4 = pnand %p603_p3, %p600_p2 }
  0x2e   :  { %608 = shalt.err (!%p605_p4)
}
  0x2f   :  { %s609_s0 = scalar_lea.vmem %s48_s30, 2048  ;;  %p614_p6 = scmp.lt.s32.totalorder %s48_s30, %s48_s30 }
  0x30   :  { %p610_p5 = scmp.ne.s32.totalorder %s48_s30, %s609_s0  ;;  %p615_p7 = scmp.lt.s32.totalorder %s609_s0, %s609_s0 }
  0x32   :  { %p616_p8 = por %p615_p7, %p614_p6 }
  0x34   :  { %p617_p9 = pnand %p616_p8, %p610_p5 }
  0x36   :  { %620 = shalt.err (!%p617_p9)
}
  0x37   :  { %53 = dma.hbm_to_vmem [thread:$0]  %s839_s3, 2048, %s48_s30, [#allocation6], %s674_s11, %s674_s11, %s675_s12  }
  0x38   :  { %s621_s23 = scalar_lea.hbm %s841_s5, 2048 }
  0x39   :  { %p622_p10 = scmp.ne.s32.totalorder %s841_s5, %s621_s23  ;;  %p625_p11 = scmp.lt.u32.totalorder %s621_s23, %s841_s5 }
  0x3b   :  { %p627_p12 = pnand %p625_p11, %p622_p10 }
  0x3d   :  { %630 = shalt.err (!%p627_p12)
}
  0x3e   :  { %s631_s29 = scalar_lea.vmem %s755_s9, 2048  ;;  %p636_p0 = scmp.lt.s32.totalorder %s755_s9, %s755_s9 }
  0x3f   :  { %p632_p13 = scmp.ne.s32.totalorder %s755_s9, %s631_s29  ;;  %p637_p1 = scmp.lt.s32.totalorder %s631_s29, %s631_s29 }
  0x41   :  { %p638_p2 = por %p637_p1, %p636_p0 }
  0x43   :  { %p639_p3 = pnand %p638_p2, %p632_p13 }
  0x45   :  { %642 = shalt.err (!%p639_p3)
}
  0x46   :  { %67 = dma.hbm_to_vmem [thread:$0]  %s841_s5, 2048, %s755_s9, [#allocation9], %s674_s11, %s674_s11, %s675_s12  }
  0x47   :  { %665 = dma.done.wait [#allocation3], 128  }
  0x48   :  { %666 = vsyncadd [#allocation3], 4294967168 }
  0x49   :  { %667 = dma.done.wait [#allocation6], 2304  }
  0x4a   :  { %668 = vsyncadd [#allocation6], 4294964992 }
  0x4b   :  { %669 = dma.done.wait [#allocation9], 2048  }
  0x4c   :  { %670 = vsyncadd [#allocation9], 4294965248  ;;  %v681_v0 = vmov 0.0|0.0   ;;  %vm682_vm0 = vmmov 0   ;;  %v683_v1 = vmov 0.0   ;;  %v83_v2 = vld [vmem:[#allocation5] sm:$0xff] }
  0x4d   :  { %492 = vmatprep.subr.bf16.mxu0 %v681_v0  ;;  %419 = vmatprep.mubr.msk.f32.mxu0 %vm682_vm0, %v683_v1  ;;  %v84_v3 = vld [vmem:[#allocation5 + $0x8] sm:$0xff]  ;;  %v167_v5 = vld [vmem:[#allocation7] sm:$0xff]  ;;  %v168_v6 = vld [vmem:[#allocation7 + $0x8] sm:$0xff]  ;;  %vm92_vm1 = vcmask 130048  }
  0x4e   :  { %495 = vmatprep.subr.bf16.mxu1 %v681_v0  ;;  %454 = vmatprep.mubr.msk.f32.mxu1 %vm682_vm0, %v683_v1  ;;  %v493_v4 = vpack.c.bf16 %v84_v3, %v83_v2  ;;  %v169_v7 = vld [vmem:[#allocation7 + $0x10] sm:$0xff]  ;;  %v496_v8 = vpack.c.bf16 %v168_v6, %v167_v5  ;;  %v170_v9 = vld [vmem:[#allocation7 + $0x18] sm:$0xff]  ;;  %v82_v10 = vld [vmem:[#allocation2] sm:$0xff] }
  0x4f   :  { %v499_v11 = vpack.c.bf16 %v170_v9, %v169_v7  ;;  %v171_v12 = vld [vmem:[#allocation7 + $0x20] sm:$0xff]  ;;  %v172_v13 = vld [vmem:[#allocation7 + $0x28] sm:$0xff]  ;;  %v173_v15 = vld [vmem:[#allocation7 + $0x30] sm:$0xff] }
  0x50   :  { %494 = vmatpush3.bf16.msra.mxu0 %v493_v4  ;;  %497 = vmatpush3.bf16.msra.mxu1 %v496_v8  ;;  %v502_v14 = vpack.c.bf16 %v172_v13, %v171_v12  ;;  %v174_v16 = vld [vmem:[#allocation7 + $0x38] sm:$0xff]  ;;  %v175_v18 = vld [vmem:[#allocation7 + $0x40] sm:$0xff]  ;;  %v176_v19 = vld [vmem:[#allocation7 + $0x48] sm:$0xff] }
  0x51   :  { %519 = vmatprep.subr.bf16.mxu0 %v681_v0  ;;  %498 = vmatprep.subr.bf16.mxu1 %v681_v0  ;;  %v505_v17 = vpack.c.bf16 %v174_v16, %v173_v15  ;;  %v508_v20 = vpack.c.bf16 %v176_v19, %v175_v18  ;;  %v177_v21 = vld [vmem:[#allocation7 + $0x50] sm:$0xff]  ;;  %v178_v22 = vld [vmem:[#allocation7 + $0x58] sm:$0xff]  ;;  %v179_v24 = vld [vmem:[#allocation7 + $0x60] sm:$0xff] }
  0x52   :  { %v511_v23 = vpack.c.bf16 %v178_v22, %v177_v21  ;;  %v180_v25 = vld [vmem:[#allocation7 + $0x68] sm:$0xff]  ;;  %v181_v27 = vld [vmem:[#allocation7 + $0x70] sm:$0xff]  ;;  %v182_v28 = vld [vmem:[#allocation7 + $0x78] sm:$0xff] }
  0x53   :  { %420 = vmatmul.mubr.msk.f32.vlgmr.msra.gmra.mrb[0].mxu0 %vm92_vm1, %v82_v10  ;;  %v514_v26 = vpack.c.bf16 %v180_v25, %v179_v24  ;;  %v517_v29 = vpack.c.bf16 %v182_v28, %v181_v27  ;;  %v261_v30 = vld [vmem:[#allocation8] sm:$0xff]  ;;  %v262_v31 = vld [vmem:[#allocation8 + $0x8] sm:$0xff]  ;;  %v263_v32 = vld [vmem:[#allocation8 + $0x10] sm:$0xff] }
  0x54   :  { %489 = vmatprep.mubr.msk.f32.mxu0 %vm682_vm0, %v683_v1  ;;  %500 = vmatpush3.bf16.msra.mxu1 %v499_v11  ;;  %v520_v33 = vpack.c.bf16 %v262_v31, %v261_v30  ;;  %v264_v34 = vld [vmem:[#allocation8 + $0x18] sm:$0xff]  ;;  %v265_v36 = vld [vmem:[#allocation8 + $0x20] sm:$0xff]  ;;  %v266_v37 = vld [vmem:[#allocation8 + $0x28] sm:$0xff] }
  0x55   :  { %501 = vmatprep.subr.bf16.mxu1 %v681_v0  ;;  %v523_v35 = vpack.c.bf16 %v264_v34, %v263_v32  ;;  %v526_v38 = vpack.c.bf16 %v266_v37, %v265_v36  ;;  %v267_v39 = vld [vmem:[#allocation8 + $0x30] sm:$0xff]  ;;  %v268_v40 = vld [vmem:[#allocation8 + $0x38] sm:$0xff]  ;;  %v269_v42 = vld [vmem:[#allocation8 + $0x40] sm:$0xff] }
  0x56   :  { %521 = vmatpush3.bf16.msra.mxu0 %v520_v33  ;;  %v529_v41 = vpack.c.bf16 %v268_v40, %v267_v39  ;;  %v270_v43 = vld [vmem:[#allocation8 + $0x48] sm:$0xff]  ;;  %v271_v45 = vld [vmem:[#allocation8 + $0x50] sm:$0xff]  ;;  %v272_v46 = vld [vmem:[#allocation8 + $0x58] sm:$0xff] }
  0x57   :  { %522 = vmatprep.subr.bf16.mxu0 %v681_v0  ;;  %v532_v44 = vpack.c.bf16 %v270_v43, %v269_v42  ;;  %v535_v47 = vpack.c.bf16 %v272_v46, %v271_v45  ;;  %v273_v48 = vld [vmem:[#allocation8 + $0x60] sm:$0xff]  ;;  %v274_v49 = vld [vmem:[#allocation8 + $0x68] sm:$0xff]  ;;  %v275_v56 = vld [vmem:[#allocation8 + $0x70] sm:$0xff] }
  0x58   :  { %503 = vmatpush3.bf16.msra.mxu1 %v502_v14  ;;  %v538_v50 = vpack.c.bf16 %v274_v49, %v273_v48  ;;  %v374_v51 = vld [vmem:[%s838_s2] ss:$0 sm:$0xff]  ;;  %v276_v57 = vld [vmem:[#allocation8 + $0x78] sm:$0xff] }
  0x59   :  { %504 = vmatprep.subr.bf16.mxu1 %v681_v0  ;;  %v541_v58 = vpack.c.bf16 %v276_v57, %v275_v56  ;;  %v376_v59 = vld [vmem:[%s840_s4] ss:$0 sm:$0xff] }
  0x5a   :  { %524 = vmatpush3.bf16.msra.mxu0 %v523_v35 }
  0x5b   :  { %525 = vmatprep.subr.bf16.mxu0 %v681_v0 }
  0x5c   :  { %506 = vmatpush3.bf16.msra.mxu1 %v505_v17 }
  0x5d   :  { %507 = vmatprep.subr.bf16.mxu1 %v681_v0 }
  0x5e   :  { %527 = vmatpush3.bf16.msra.mxu0 %v526_v38 }
  0x5f   :  { %528 = vmatprep.subr.bf16.mxu0 %v681_v0 }
  0x60   :  { %509 = vmatpush3.bf16.msra.mxu1 %v508_v20 }
  0x61   :  { %510 = vmatprep.subr.bf16.mxu1 %v681_v0 }
  0x62   :  { %530 = vmatpush3.bf16.msra.mxu0 %v529_v41 }
  0x63   :  { %531 = vmatprep.subr.bf16.mxu0 %v681_v0 }
  0x64   :  { %512 = vmatpush3.bf16.msra.mxu1 %v511_v23 }
  0x65   :  { %513 = vmatprep.subr.bf16.mxu1 %v681_v0 }
  0x66   :  { %533 = vmatpush3.bf16.msra.mxu0 %v532_v44 }
  0x67   :  { %534 = vmatprep.subr.bf16.mxu0 %v681_v0 }
  0x68   :  { %515 = vmatpush3.bf16.msra.mxu1 %v514_v26 }
  0x69   :  { %516 = vmatprep.subr.bf16.mxu1 %v681_v0 }
  0x6a   :  { %536 = vmatpush3.bf16.msra.mxu0 %v535_v47 }
  0x6b   :  { %537 = vmatprep.subr.bf16.mxu0 %v681_v0 }
  0x6c   :  { %518 = vmatpush3.bf16.msra.mxu1 %v517_v29 }
  0x6e   :  { %539 = vmatpush3.bf16.msra.mxu0 %v538_v50 }
  0x6f   :  { %540 = vmatprep.subr.bf16.mxu0 %v681_v0  ;;  %v377_v0 = vld [vmem:[%s842_s6] ss:$0 sm:$0xff] }
  0x72   :  { %542 = vmatpush3.bf16.msra.mxu0 %v541_v58 }
 0x126   :  { %v162_v52 = vpop.f32.mrb[0].mxu0 }
 0x127   :  { %v163_v53 = vadd.f32 %v374_v51, %v162_v52  ;;  %v421_v54 = vpop.f32.mrb[1].mxu0 }
 0x129   :  { %v166_v55 = vmax.f32 %v163_v53, 0.0 }
 0x12b   :  { %455 = vmatmul.mubr.f32.vlgmr.msra.gmra.mrb[0].mxu1 %v166_v55 }
 0x1fe   :  { %v256_v60 = vpop.f32.mrb[0].mxu1 }
 0x1ff   :  { %v257_v61 = vadd.f32 %v376_v59, %v256_v60  ;;  %v456_v62 = vpop.f32.mrb[1].mxu1 }
 0x201   :  { %v260_v63 = vmax.f32 %v257_v61, 0.0 }
 0x203   :  { %490 = vmatmul.mubr.f32.vlgmr.msra.gmra.mrb[2].mxu0 %v260_v63 }
 0x2d6   :  { %v350_v1 = vpop.f32.mrb[2].mxu0 }
 0x2d7   :  { %v351_v2 = vadd.f32 %v377_v0, %v350_v1  ;;  %v491_v3 = vpop.f32.mrb[3].mxu0 }
 0x2d9   :  { %354 = vst [vmem:[#allocation10] sm:$0xff] %v351_v2 }
 0x2da   :  { %359 = vsyncadd [#allocation4], 96  ;;  %s684_s10 = smov [#allocation10]  }
 0x2db   :  { %s360_s13 = sshll.u32 %s684_s10, 4  ;;  %s361_s13 = int_to_ptr.vmem [resolvable:$true] %s360_s13 }
 0x2dc   :  { %s643_s14 = scalar_lea.vmem %s361_s13, 32  ;;  %s647_s4 = scalar_lea.vmem %s361_s13, 128 }
 0x2dd   :  { %p644_p4 = scmp.ne.s32.totalorder %s361_s13, %s643_s14  ;;  %p648_p5 = scmp.lt.s32.totalorder %s361_s13, %s361_s13 }
 0x2de   :  { %p649_p6 = scmp.lt.s32.totalorder %s647_s4, %s643_s14 }
 0x2e0   :  { %p650_p7 = por %p649_p6, %p648_p5 }
 0x2e2   :  { %p651_p8 = pnand %p650_p7, %p644_p4 }
 0x2e4   :  { %654 = shalt.err (!%p651_p8)
}
 0x2e5   :  { %s655_s6 = scalar_lea.hbm %s843_s7, 32 }
 0x2e6   :  { %p656_p9 = scmp.ne.s32.totalorder %s843_s7, %s655_s6  ;;  %p659_p10 = scmp.lt.u32.totalorder %s655_s6, %s843_s7 }
 0x2e8   :  { %p661_p11 = pnand %p659_p10, %p656_p9 }
 0x2ea   :  { %664 = shalt.err (!%p661_p11)
}
 0x2eb   :  { %366 = dma.vmem_to_hbm [thread:$0]  %s361_s13, 32, %s843_s7, [#allocation4], %s677_s25, %s677_s25, %s678_s26  }
 0x2ec   :  { %671 = dma.done.wait [#allocation4], 128  }
 0x2ed   :  { %672 = vsyncadd [#allocation4], 4294967168 }
 0x2ee   :  { %370 = vsyncpa [#allocation3], 1 }
 0x2ef   :  { %371 = vsyncpa [#allocation6], 1 }
 0x2f0   :  { %372 = vsyncpa [#allocation9], 1 }
 0x2f1   :  { %373 = vsyncpa [#allocation4], 1 }

</bundles_post_ra>
